<compile_context>
chip_gen: v7x
topology: tpu7x:2x2x1
jax: 0.10.0
libtpu: 0.0.40
codegen_flags: <defaults>
</compile_context>

<pallas_src>
import jax
import jax.numpy as jnp
from jax.experimental import pallas as pl
from jax.experimental.pallas import tpu as pltpu


def _code_wise_attention_kernel(q_ref, c_ref, o_ref):
    # q_ref: (Bt, Lq, D), c_ref: (Bt, Lc, D), o_ref: (Bt, 1, D)
    q = q_ref[...]
    c = c_ref[...]

    # S = context @ query^T over D (lane-dim contraction, no explicit
    # transpose), f32 accumulation on the MXU regardless of input dtype.
    s = jnp.einsum("bld,bqd->blq", c, q,
                   preferred_element_type=jnp.float32)      # (Bt, Lc, Lq) f32

    # Row-wise max over the query axis (PyTorch dim=2) -> (Bt, Lc, 1)
    m = jnp.max(s, axis=2, keepdims=True)

    # Numerically-stable softmax over the context axis; normalization deferred.
    m_max = jnp.max(m, axis=1, keepdims=True)                # (Bt, 1, 1)
    e = jnp.exp(m - m_max)                                   # (Bt, Lc, 1) f32
    denom = jnp.sum(e, axis=1, keepdims=True)                # (Bt, 1, 1)

    # Weighted sum on the VPU/XLU instead of an M=1 GEMV; scale only the final
    # (Bt, 1, D) row by 1/denom (exact reciprocal keeps tight tolerance).
    weighted = jnp.sum(e * c, axis=1, keepdims=True)         # (Bt, 1, D) f32
    out = weighted * pl.reciprocal(denom, approx=False)

    o_ref[...] = out.astype(o_ref.dtype)

    # TODO(synk): for long Lc/Lq, add an "arbitrary" Lc-tile grid axis with
    # online-softmax scratch accumulators so the (Lc, Lq) score block is never
    # fully materialized (needed for v7x's 64 MiB VMEM at large sequence len).


def _pick_block_b(B):
    """Batch-block size: amortize per-step overhead, keep >=2 grid steps."""
    if B <= 1:
        return 1
    bt = min(8, max(1, B // 2))
    while B % bt != 0:
        bt -= 1
    return max(bt, 1)


def code_wise_attention(query, context):
    """query: (B, Lq, D), context: (B, Lc, D) -> (B, 1, D)"""
    B, Lq, D = query.shape
    Bc, Lc, Dc = context.shape
    assert B == Bc and D == Dc

    Bt = _pick_block_b(B)
    dtype_bytes = jnp.dtype(query.dtype).itemsize
    cost = pl.CostEstimate(
        flops=2 * B * Lc * Lq * D + 2 * B * Lc * D,
        transcendentals=B * Lc,
        bytes_accessed=(B * Lq * D + B * Lc * D + B * D) * dtype_bytes,
    )

    return pl.pallas_call(
        _code_wise_attention_kernel,
        out_shape=jax.ShapeDtypeStruct((B, 1, D), query.dtype),
        grid_spec=pltpu.PrefetchScalarGridSpec(
            num_scalar_prefetch=0,
            grid=(B // Bt,),
            in_specs=[
                pl.BlockSpec((Bt, Lq, D), lambda b: (b, 0, 0)),
                pl.BlockSpec((Bt, Lc, D), lambda b: (b, 0, 0)),
            ],
            out_specs=pl.BlockSpec((Bt, 1, D), lambda b: (b, 0, 0)),
        ),
        compiler_params=pltpu.CompilerParams(
            dimension_semantics=("parallel",),
        ),
        cost_estimate=cost,
    )(query, context)


def _reference(query, context):
    # Plain-JAX reference mirroring the PyTorch module exactly.
    S = jnp.einsum("bld,bqd->blq", context, query)              # (B, Lc, Lq)
    attn = jax.nn.softmax(jnp.max(S, axis=2), axis=-1)          # (B, Lc)
    return jnp.einsum("bl,bld->bd", attn, context)[:, None, :]  # (B, 1, D)


if __name__ == "__main__":
    key = jax.random.PRNGKey(0)
    k1, k2 = jax.random.split(key)

    B, Lq, Lc, D = 2, 8, 16, 32
    query = jax.random.normal(k1, (B, Lq, D), dtype=jnp.float32)
    context = jax.random.normal(k2, (B, Lc, D), dtype=jnp.float32)

    out = code_wise_attention(query, context)
    out = jax.block_until_ready(out)

    ref = _reference(query, context)
    assert out.shape == (B, 1, D)
    assert jnp.allclose(out, ref, atol=1e-5, rtol=1e-5), "mismatch vs reference"

    print("KERNEL_OK")
</pallas_src>

<mosaic_0001>
module attributes {stable_mosaic.version = 11 : i64} {
  func.func @_code_wise_attention_kernel(%arg0: i32, %arg1: memref<1x8x32xf32, #tpu.memory_space<vmem>>, %arg2: memref<1x16x32xf32, #tpu.memory_space<vmem>>, %arg3: memref<1x1x32xf32, #tpu.memory_space<vmem>>) attributes {dimension_semantics = [#tpu.dimension_semantics<parallel>], iteration_bounds = array<i64: 2>, scalar_prefetch = 0 : i64, scratch_operands = 0 : i64, tpu.core_type = #tpu.core_type<tc>, window_params = [{transform_indices = @transform_0, window_bounds = array<i64: 1, 8, 32>}, {transform_indices = @transform_1, window_bounds = array<i64: 1, 16, 32>}, {transform_indices = @transform_2, window_bounds = array<i64: 1, 1, 32>}]} {
    %c0 = arith.constant 0 : index
    %c0_0 = arith.constant 0 : index
    %c0_1 = arith.constant 0 : index
    %0 = vector.load %arg1[%c0, %c0_0, %c0_1] : memref<1x8x32xf32, #tpu.memory_space<vmem>>, vector<1x8x32xf32>
    %c0_2 = arith.constant 0 : index
    %c0_3 = arith.constant 0 : index
    %c0_4 = arith.constant 0 : index
    %1 = vector.load %arg2[%c0_2, %c0_3, %c0_4] : memref<1x16x32xf32, #tpu.memory_space<vmem>>, vector<1x16x32xf32>
    "tpu.trace_start"() <{level = 10 : i32, message = "bld,bqd->blq"}> : () -> ()
    %cst = arith.constant dense<0.000000e+00> : vector<1x16x8xf32>
    %2 = tpu.matmul %1, %0, %cst {dimension_numbers = #tpu.dot_dimension_numbers<[2], [2], [1], [1], [0, 0, 0, 1, 1, 1], [0], [0]>} : vector<1x16x32xf32>, vector<1x8x32xf32>, vector<1x16x8xf32> -> vector<1x16x8xf32>
    "tpu.trace_stop"() : () -> ()
    %cst_5 = arith.constant dense<0xFF800000> : vector<1x16xf32>
    %3 = vector.multi_reduction <maximumf>, %2, %cst_5 [2] : vector<1x16x8xf32> to vector<1x16xf32>
    %4 = vector.shape_cast %3 : vector<1x16xf32> to vector<1x16x1xf32>
    %cst_6 = arith.constant dense<0xFF800000> : vector<1x1xf32>
    %5 = vector.multi_reduction <maximumf>, %4, %cst_6 [1] : vector<1x16x1xf32> to vector<1x1xf32>
    %6 = vector.shape_cast %5 : vector<1x1xf32> to vector<1x1x1xf32>
    %7 = vector.broadcast %6 : vector<1x1x1xf32> to vector<1x16x1xf32>
    %8 = arith.subf %4, %7 : vector<1x16x1xf32>
    %9 = math.exp %8 : vector<1x16x1xf32>
    %cst_7 = arith.constant dense<0.000000e+00> : vector<1x1xf32>
    %10 = vector.multi_reduction <add>, %9, %cst_7 [1] : vector<1x16x1xf32> to vector<1x1xf32>
    %11 = vector.shape_cast %10 : vector<1x1xf32> to vector<1x1x1xf32>
    %12 = vector.broadcast %9 : vector<1x16x1xf32> to vector<1x16x32xf32>
    %13 = arith.mulf %12, %1 : vector<1x16x32xf32>
    %cst_8 = arith.constant dense<0.000000e+00> : vector<1x32xf32>
    %14 = vector.multi_reduction <add>, %13, %cst_8 [1] : vector<1x16x32xf32> to vector<1x32xf32>
    %15 = vector.shape_cast %14 : vector<1x32xf32> to vector<1x1x32xf32>
    %16 = tpu.reciprocal %11 : vector<1x1x1xf32> -> vector<1x1x1xf32>
    %17 = vector.broadcast %16 : vector<1x1x1xf32> to vector<1x1x32xf32>
    %18 = arith.mulf %15, %17 : vector<1x1x32xf32>
    %c0_9 = arith.constant 0 : index
    %c0_10 = arith.constant 0 : index
    %c0_11 = arith.constant 0 : index
    %19 = vector.load %arg3[%c0_9, %c0_10, %c0_11] : memref<1x1x32xf32, #tpu.memory_space<vmem>>, vector<1x1x32xf32>
    tpu.vector_store %arg3[%c0_9, %c0_10, %c0_11], %18 {strides = array<i32>} : memref<1x1x32xf32, #tpu.memory_space<vmem>>, vector<1x1x32xf32>,
    return
  }
  func.func @transform_0(%arg0: i32) -> (i32, i32, i32) {
    %c0_i32 = arith.constant 0 : i32
    %c0_i32_0 = arith.constant 0 : i32
    %c0_i32_1 = arith.constant 0 : i32
    return %arg0, %c0_i32, %c0_i32_0 : i32, i32, i32
  }
  func.func @transform_1(%arg0: i32) -> (i32, i32, i32) {
    %c0_i32 = arith.constant 0 : i32
    %c0_i32_0 = arith.constant 0 : i32
    %c0_i32_1 = arith.constant 0 : i32
    return %arg0, %c0_i32, %c0_i32_0 : i32, i32, i32
  }
  func.func @transform_2(%arg0: i32) -> (i32, i32, i32) {
    %c0_i32 = arith.constant 0 : i32
    %c0_i32_0 = arith.constant 0 : i32
    %c0_i32_1 = arith.constant 0 : i32
    return %arg0, %c0_i32, %c0_i32_0 : i32, i32, i32
  }
}

</mosaic_0001>

<bundles_post_ra>
// kernel: tpu_custom_call.1
= control target key start
LH: loop header
LB: loop body
LE: loop exit
PB: predicated region body
PF: predicated region fallthrough
CT: control target
= control target key end

     0   :  { %7 = vsyncpa [#allocation3], 0  ;;  %s886_s0 = inlined_call_operand.hbm [shape: f32[2,8,32], index: 0, kind: input, shape index: {}]   ;;  %s887_s1 = inlined_call_operand.hbm [shape: f32[2,16,32], index: 1, kind: input, shape index: {}]   ;;  %s888_s2 = inlined_call_operand.hbm [shape: f32[2,1,32], index: 2, kind: output, shape index: {}]  }
   0x1   :  { %9 = vsyncpa [#allocation3 + $0x1], 0 }
   0x2   :  { %10 = vsyncpa [#allocation6], 0 }
   0x3   :  { %12 = vsyncpa [#allocation6 + $0x1], 0 }
   0x4   :  { %13 = vsyncpa [#allocation4], 0 }
   0x5   :  { %15 = vsyncpa [#allocation4 + $0x1], 0  ;;  %s667_s9 = smov 0   ;;  %s669_s10 = smov 0  }
   0x6   :  { %s671_s11 = smov 0   ;;  %s673_s12 = smov 0  }
   0x7 LB: > { %s688_s13 = sadd.s32 4294967295, %s645_s12   ;;  %s430_s14 = sadd.s32 4294967294, %s645_s12   ;;  %s645_s12 = sphi %s673_s12, %s906_s12   ;;  %s641_s11 = sphi %s671_s11, %s905_s11   ;;  %s637_s10 = sphi %s669_s10, %s904_s10   ;;  %s633_s9 = sphi %s667_s9, %s903_s9  }
   0x8   : > { %s692_s15 = sadd.s32 1, %s645_s12   ;;  %s28_s16 = sadd.s32 1, %s641_s11 }
   0x9   : > { %s25_s17 = ssub.s32 %s645_s12, %s692_s15  ;;  %p35_p0 = scmp.ne.s32.totalorder %s641_s11, %s637_s10 }
   0xa   : > { %p26_p1 = scmp.eq.s32.totalorder %s25_s17, 0  ;;  %p36_p2 = scmp.eq.s32.totalorder %s645_s12, 0 }
   0xb   : > { %p41_p3 = scmp.ne.s32.totalorder %s637_s10, %s633_s9  ;;  %p42_p4 = scmp.eq.s32.totalorder %s688_s13, 0 }
   0xc   : > { %s704_s18 = scalar_select %p26_p1, %s641_s11, %s28_s16  }
   0xd   : > { %p706_p5 = por %p36_p2, %p35_p0  ;;  %p710_p6 = por %p42_p4, %p41_p3 }
   0xe   : > { %p91_p7 = scmp.eq.s32.totalorder %s688_s13, 1  ;;  %p97_p8 = scmp.eq.s32.totalorder %s430_s14, 1 }
   0xf   : > { %s892_s20 = scalar_select %p710_p6, 1, 0 }
  0x10   : > { %p473_p10 = scmp.lt.s32.totalorder %s645_s12, 2  ;;  %p717_p11 = por %p91_p7, %p35_p0 }
  0x11   : > { %p721_p12 = por %p97_p8, %p41_p3  ;;  %s726_s23 = sand.u32 1, %s641_s11  }
  0x12   : > { %s893_s21 = scalar_select %p717_p11, 1, 0 }
  0x13   : > { %s894_s22 = scalar_select %p721_p12, 1, 0 }
  0x14   : > { %s434_s24 = sshll.u32 %s645_s12, 7  ;;  %s433_s25 = sshll.u32 %s726_s23, 3 }
  0x15   : > { %s733_s28 = scalar_lea.hbm %s886_s0, %s434_s24  ;;  %s121_s29 = scalar_lea.vmem [#allocation2], %s433_s25 }
  0x16   : > { %s128_s30 = sshll.u32 %s121_s29, 4  ;;  %p737_p13 = pnand %p473_p10, %p706_p5  ;;  %s741_s30 = int_to_ptr.vmem [resolvable:$true] %s128_s30 }
  0x17   : > { %s118_s4 = scalar_lea.sflag [#allocation3], %s726_s23  ;;  %s515_s5 = scalar_lea.hbm %s733_s28, 128 }
  0x18   : > { %p516_p2 = scmp.ne.s32.totalorder %s733_s28, %s515_s5  ;;  %p517_p3 = pneg %p737_p13 }
  0x19   : > { %s520_s8 = scalar_lea.hbm %s886_s0, 256  ;;  %p521_p5 = scmp.lt.u32.totalorder %s733_s28, %s886_s0 }
  0x1a   : > { %p518_p4 = pnand %p517_p3, %p516_p2  ;;  %p522_p8 = scmp.lt.u32.totalorder %s520_s8, %s515_s5 }
  0x1b   : > { %p524_p9 = scmp.lt.u32.totalorder %s515_s5, %s733_s28 }
  0x1c   : > { %p519_p7 = pneg %p518_p4  ;;  %p523_p10 = por %p522_p8, %p521_p5 }
  0x1e   : > { %p525_p0 = por %p524_p9, %p523_p10 }
  0x20   : > { %p526_p1 = pnand %p525_p0, %p519_p7 }
  0x22   : > { %529 = shalt.err (!%p526_p1)
}
  0x23   : > { %s530_s17 = scalar_lea.vmem %s741_s30, 128  ;;  %s647_s19 = smov [#allocation2]  }
  0x24   : > { %p531_p2 = scmp.ne.s32.totalorder %s741_s30, %s530_s17  ;;  %s535_s24 = sshll.u32 %s647_s19, 4  ;;  %s536_s24 = int_to_ptr.vmem [resolvable:$false] %s535_s24 }
  0x25   : > { %s537_s25 = scalar_lea.vmem %s536_s24, 256  ;;  %p538_p11 = scmp.lt.s32.totalorder %s741_s30, %s536_s24 }
  0x26   : > { %p533_p4 = pnand %p531_p2, %p517_p3  ;;  %p539_p5 = scmp.lt.s32.totalorder %s537_s25, %s530_s17 }
  0x28   : > { %p534_p12 = pneg %p533_p4  ;;  %p540_p8 = por %p539_p5, %p538_p11 }
  0x2a   : > { %p541_p9 = pnand %p540_p8, %p534_p12 }
  0x2c   : > { %544 = shalt.err (!%p541_p9)
}
  0x2d   : > { %465 = dma.hbm_to_vmem [thread:$0]  (!%p737_p13), %s733_s28, 128, %s741_s30, %s118_s4  }
  0x2e   : > { %p896_p0 = scmp.lt.s32.totalorder %s645_s12, 3  ;;  %p897_p1 = scmp.ge.s32.totalorder %s645_s12, 1 }
  0x2f   : > { %s435_s27 = sshll.u32 %s726_s23, 4  ;;  %s447_s29 = sshll.u32 %s645_s12, 8 }
  0x30   : > { %p775_p7 = pnand %p897_p1, %p896_p0  ;;  %s784_s7 = scalar_lea.hbm %s887_s1, %s447_s29 }
  0x31   : > { %s139_s8 = scalar_lea.vmem [#allocation5], %s435_s27  ;;  %s136_s28 = scalar_lea.sflag [#allocation6], %s726_s23 }
  0x32   : > { %s146_s14 = sshll.u32 %s139_s8, 4  ;;  %s545_s30 = scalar_lea.hbm %s784_s7, 256  ;;  %s786_s14 = int_to_ptr.vmem [resolvable:$true] %s146_s14 }
  0x33   : > { %p546_p11 = scmp.ne.s32.totalorder %s784_s7, %s545_s30  ;;  %s550_s17 = scalar_lea.hbm %s887_s1, 512 }
  0x34   : > { %p551_p2 = scmp.lt.u32.totalorder %s784_s7, %s887_s1  ;;  %p552_p4 = scmp.lt.u32.totalorder %s550_s17, %s545_s30 }
  0x35   : > { %p548_p12 = pnand %p546_p11, %p517_p3  ;;  %p554_p8 = scmp.lt.u32.totalorder %s545_s30, %s784_s7 }
  0x36   : > { %p553_p5 = por %p552_p4, %p551_p2 }
  0x37   : > { %p549_p10 = pneg %p548_p12 }
  0x38   : > { %p555_p9 = por %p554_p8, %p553_p5 }
  0x3a   : > { %p556_p0 = pnand %p555_p9, %p549_p10 }
  0x3c   : > { %559 = shalt.err (!%p556_p0)
}
  0x3d   : > { %s560_s25 = scalar_lea.vmem %s786_s14, 256  ;;  %s648_s27 = smov [#allocation5]  }
  0x3e   : > { %p561_p1 = scmp.ne.s32.totalorder %s786_s14, %s560_s25  ;;  %s565_s29 = sshll.u32 %s648_s27, 4  ;;  %s566_s29 = int_to_ptr.vmem [resolvable:$false] %s565_s29 }
  0x3f   : > { %s567_s5 = scalar_lea.vmem %s566_s29, 512  ;;  %p568_p6 = scmp.lt.s32.totalorder %s786_s14, %s566_s29 }
  0x40   : > { %p563_p11 = pnand %p561_p1, %p517_p3  ;;  %p569_p2 = scmp.lt.s32.totalorder %s567_s5, %s560_s25 }
  0x42   : > { %p564_p12 = pneg %p563_p11  ;;  %p570_p4 = por %p569_p2, %p568_p6 }
  0x44   : > { %p571_p5 = pnand %p570_p4, %p564_p12 }
  0x46   : > { %574 = shalt.err (!%p571_p5)
}
  0x47   : > { %s649_s6 = smov 128   ;;  %s650_s8 = smov 8  }
  0x48   : > { %468 = dma.hbm_to_vmem [thread:$0]  (!%p737_p13), %s784_s7, 256, %s786_s14, %s136_s28, %s649_s6, %s649_s6, %s650_s8  }
  0x49   : > { %158 = sbr.rel (%p775_p7) target bundleno = 520 (0x208), region = 28  ;;  %s817_s30 = sand.u32 (!%p775_p7), 1, %s637_s10  }
  0x4a   : > { %s439_s4 = sshll.u32 (!%p775_p7), %s817_s30, 3  ;;  %s161_s16 = scalar_lea.sflag (!%p775_p7), [#allocation3], %s817_s30 }
  0x4b   : > { %s164_s17 = scalar_lea.vmem (!%p775_p7), [#allocation2], %s439_s4  ;;  %p899_p6 = scmp.ne.s32.totalorder (!%p775_p7), %s892_s20, 0 }
  0x50   : > { %620 = dma.done.wait (%p899_p6), %s161_s16, 128  }
  0x51   : > { %622 = vsyncadd (%p899_p6), %s161_s16, 4294967168  ;;  %s440_s23 = sshll.u32 %s817_s30, 4  ;;  %s170_s3 = scalar_lea.sflag [#allocation6], %s817_s30 }
  0x52   : > { %s173_s26 = scalar_lea.vmem [#allocation5], %s440_s23 }
  0x53   : > { %624 = dma.done.wait (%p899_p6), %s170_s3, 256  }
  0x54   : > { %626 = vsyncadd (%p899_p6), %s170_s3, 4294967040  ;;  %vm201_vm0 = vcmask 261120   ;;  %v198_v0 = vld [vmem:[%s164_s17] sm:$0xff]  ;;  %v199_v1 = vld [vmem:[%s173_s26] sm:$0xff]  ;;  %vm286_vm1 = vcmask 64512   ;;  %s444_s20 = sshll.u32 %s688_s13, 4 }
  0x55   : > { %451 = vmatprep.subr.msk.mxu0 %vm201_vm0, %v198_v0  ;;  %453 = vmatprep.mubr.msk.f32.mxu0 %vm201_vm0, %v199_v1  ;;  %v200_v2 = vld [vmem:[%s173_s26 + $0x8] sm:$0xff]  ;;  %s197_s7 = scalar_lea.vmem [#allocation7], %s817_s30  ;;  %vm326_vm2 = vcmask 253952   ;;  %s842_s24 = scalar_lea.hbm %s888_s2, %s444_s20 }
  0x56   : > { %452 = vmatpush3.xpose.msk.msra.mxu0 %vm201_vm0, %v198_v0  ;;  %s341_s14 = sshll.u32 %s197_s7, 4  ;;  %s329_s25 = scalar_lea.sflag [#allocation4], %s817_s30  ;;  %s844_s14 = int_to_ptr.vmem [resolvable:$true] %s341_s14 }
  0x57   : > { %s575_s27 = scalar_lea.vmem %s844_s14, 16  ;;  %p900_p3 = scmp.ne.s32.totalorder %s893_s21, 0 }
  0x58   : > { %p576_p13 = scmp.ne.s32.totalorder %s844_s14, %s575_s27  ;;  %s651_s13 = smov [#allocation7]  }
  0x59   : > { %454 = vmatmul.mubr.msk.f32.vlgmr.msra.gmra.mrb[0].mxu0 %vm201_vm0, %v200_v2  ;;  %s579_s29 = sshll.u32 %s651_s13, 4  ;;  %s580_s29 = int_to_ptr.vmem [resolvable:$false] %s579_s29 }
  0x5a   : > { %p577_p7 = pnand %p576_p13, %p900_p3  ;;  %s581_s5 = scalar_lea.vmem %s580_s29, 32 }
  0x5b   : > { %p582_p8 = scmp.lt.s32.totalorder %s844_s14, %s580_s29  ;;  %p583_p9 = scmp.lt.s32.totalorder %s581_s5, %s575_s27 }
  0x5c   : > { %p578_p10 = pneg %p577_p7 }
  0x5d   : > { %p584_p0 = por %p583_p9, %p582_p8 }
  0x5f   : > { %p585_p1 = pnand %p584_p0, %p578_p10 }
 0x12c   : > { %v455_v3 = vpop.f32.mrb[0].mxu0 }
 0x12d   : > { %v277_v4 = vpop.f32.mrb[1].mxu0  ;;  %v290_v6 = vsel %vm286_vm1, %v455_v3, -inf }
 0x12e   : > { %v287_v5 = vsel %vm286_vm1, %v277_v4, -inf }
 0x12f   : > { %288 = vmax.xlane.f32.xlu0 %v287_v5 }
 0x133   : > { %291 = vmax.xlane.f32.xlu0 %v290_v6 }
 0x1bc   : > { %v289_v7 = vpop.xlane.xlu0 %288 }
 0x1c0   : > { %v292_v8 = vpop.xlane.xlu0 %291 }
 0x1c1   : > { %v293_v9 = vmax.f32 %v289_v7, %v292_v8 }
 0x1c3   : > { %v294_v10 = vrot.slane %v293_v9, 4 }
 0x1c5   : > { %v295_v11 = vmax.f32 %v293_v9, %v294_v10 }
 0x1c7   : > { %v296_v12 = vrot.slane %v295_v11, 2 }
 0x1c9   : > { %v297_v13 = vmax.f32 %v295_v11, %v296_v12 }
 0x1cb   : > { %v298_v14 = vrot.slane %v297_v13, 1 }
 0x1cd   : > { %v299_v15 = vmax.f32 %v297_v13, %v298_v14 }
 0x1cf   : > { %v300_v16 = vsub.f32 %v289_v7, %v299_v15  ;;  %v301_v17 = vsub.f32 %v292_v8, %v299_v15 }
 0x1d1   : > { %v302_v18 = vmul.f32 1.442695, %v300_v16  ;;  %v304_v19 = vmul.f32 1.442695, %v301_v17 }
 0x1d3   : > { %509 = vpow2.f32 %v302_v18 }
 0x1d4   : > { %511 = vpow2.f32 %v304_v19 }
 0x1dd   : > { %v510_v20 = vpop.eup %509 }
 0x1de   : > { %v512_v21 = vpop.eup %511  ;;  %v313_v22 = vmul.f32 %v510_v20, %v199_v1 }
 0x1df   : > { %v306_v23 = vadd.f32 %v512_v21, %v510_v20  ;;  %v314_v24 = vmul.f32 %v512_v21, %v200_v2 }
 0x1e0   : > { %v315_v25 = vsel %vm201_vm0, %v313_v22, 0.0 }
 0x1e1   : > { %v307_v26 = vrot.slane %v306_v23, 4  ;;  %v316_v27 = vsel %vm201_vm0, %v314_v24, 0.0 }
 0x1e2   : > { %v317_v28 = vadd.f32 %v316_v27, %v315_v25 }
 0x1e3   : > { %v308_v29 = vadd.f32 %v307_v26, %v306_v23 }
 0x1e4   : > { %v318_v30 = vrot.slane %v317_v28, 4 }
 0x1e5   : > { %v309_v31 = vrot.slane %v308_v29, 2 }
 0x1e6   : > { %v319_v32 = vadd.f32 %v318_v30, %v317_v28 }
 0x1e7   : > { %v310_v33 = vadd.f32 %v309_v31, %v308_v29 }
 0x1e8   : > { %v320_v35 = vrot.slane %v319_v32, 2 }
 0x1e9   : > { %v311_v34 = vrot.slane %v310_v33, 1 }
 0x1ea   : > { %v321_v37 = vadd.f32 %v320_v35, %v319_v32 }
 0x1eb   : > { %v312_v36 = vadd.f32 %v311_v34, %v310_v33 }
 0x1ec   : > { %v322_v38 = vrot.slane %v321_v37, 1 }
 0x1ed   : > { %513 = vrcp.f32 %v312_v36 }
 0x1ee   : > { %v323_v39 = vadd.f32 %v322_v38, %v321_v37 }
 0x1f7   : > { %v514_v40 = vpop.eup %513 }
 0x1f8   : > { %v325_v41 = vmul.f32 %v514_v40, %v323_v39 }
 0x1fa   : > { %327 = vst.msk [vmem:[%s197_s7] sm:$0x1] %vm326_vm2, %v325_v41 }
 0x1fb   : > { %588 = shalt.err (!%p585_p1)
}
 0x1fc   : > { %s589_s6 = scalar_lea.hbm %s842_s24, 16  ;;  %s593_s4 = scalar_lea.hbm %s888_s2, 32 }
 0x1fd   : > { %p590_p11 = scmp.ne.s32.totalorder %s842_s24, %s589_s6  ;;  %p594_p4 = scmp.lt.u32.totalorder %s842_s24, %s888_s2 }
 0x1fe   : > { %p595_p5 = scmp.lt.u32.totalorder %s593_s4, %s589_s6  ;;  %p597_p13 = scmp.lt.u32.totalorder %s589_s6, %s842_s24 }
 0x1ff   : > { %p591_p12 = pnand %p590_p11, %p900_p3 }
 0x200   : > { %p596_p6 = por %p595_p5, %p594_p4 }
 0x201   : > { %p592_p2 = pneg %p591_p12 }
 0x202   : > { %p598_p7 = por %p597_p13, %p596_p6 }
 0x204   : > { %p599_p10 = pnand %p598_p7, %p592_p2 }
 0x206   : > { %602 = shalt.err (!%p599_p10)
}
 0x207   : > { %460 = dma.vmem_to_hbm [thread:$0]  (%p900_p3), %s844_s14, 16, %s842_s24, %s329_s25  }
 0x208 PF: > { %s353_s23 = sand.u32 1, %s633_s9   ;;  %p901_p8 = scmp.ne.s32.totalorder %s894_s22, 0 }
 0x209   : > { %p902_p9 = scmp.ge.s32.totalorder %s645_s12, 2  ;;  %s354_s3 = scalar_lea.sflag [#allocation4], %s353_s23 }
 0x20b   : > { %p470_p0 = pnand %p902_p9, %p901_p8 }
 0x20d   : > { %628 = dma.done.wait (!%p470_p0), %s354_s3, 16  }
 0x20e   : > { %630 = vsyncadd (!%p470_p0), %s354_s3, 4294967280  ;;  %p18_p1 = scmp.ge.s32.totalorder %s692_s15, 4   ;;  %s903_s9 = smov %s637_s10 }
 0x20f   : > { %s904_s10 = smov %s641_s11  ;;  %s905_s11 = smov %s704_s18 }
 0x210   : > { %s906_s12 = smov %s692_s15  ;;  %20 = sbr.rel (!%p18_p1) target bundleno = 7 (0x7), region = 86 }
 0x217   :  { %358 = vsyncpa [#allocation3], 1 }
 0x218   :  { %360 = vsyncpa [#allocation3 + $0x1], 1 }
 0x219   :  { %361 = vsyncpa [#allocation6], 1 }
 0x21a   :  { %363 = vsyncpa [#allocation6 + $0x1], 1 }
 0x21b   :  { %364 = vsyncpa [#allocation4], 1 }
 0x21c   :  { %366 = vsyncpa [#allocation4 + $0x1], 1 }

</bundles_post_ra>
